<compile_context>
chip_gen: v5e
topology: v5e:2x2
jax: 0.10.0
libtpu: 0.0.40
codegen_flags: <defaults>
</compile_context>

<pallas_src>
import jax
import jax.numpy as jnp
from jax.experimental import pallas as pl
from jax.experimental.pallas import tpu as pltpu

IN_FEATURES = 784
OUT_FEATURES = 10


def _round_up(n, m):
    return ((n + m - 1) // m) * m


def net_kernel(x_ref, w_ref, o_ref):
    # x_ref: (TB, 784) batch tile, w_ref: (784, 10) grid-resident, o_ref: (TB, 10)
    logits = jnp.dot(x_ref[...], w_ref[...], preferred_element_type=jnp.float32)
    # exp(l - m) / sum(exp(l - m)) == exp(l) / sum(exp(l))  (shift-invariant),
    # same semantics as the PyTorch forward but overflow-safe.
    m = jnp.max(logits, axis=1, keepdims=True)
    h = jnp.exp(logits - m)
    z = jnp.sum(h, axis=1, keepdims=True)
    # Exact divide (no approx reciprocal): keeps normalization bit-accurate; the
    # epilogue hides entirely under the next x tile's DMA.
    o_ref[...] = (h / z).astype(o_ref.dtype)


def net_forward(x, w, *, block_b=1024):
    B = x.shape[0]
    assert x.shape == (B, IN_FEATURES)
    assert w.shape == (IN_FEATURES, OUT_FEATURES)

    # Batch tile: multiple of 8 (sublane), capped at block_b rows so the
    # double-buffered x tiles + resident W + output stay under the scoped-VMEM
    # default on every generation (v5e 16 MiB, v6e/v7x 32 MiB).
    TB = min(block_b, _round_up(B, 8))
    # Give the grid at least 2 tiles when the batch allows it so both v7x
    # TensorCores participate (harmless on single-TC v5e/v6e).
    if B > 8 and pl.cdiv(B, TB) < 2:
        TB = max(8, _round_up(pl.cdiv(B, 2), 8))

    grid = (pl.cdiv(B, TB),)

    cost = pl.CostEstimate(
        flops=2 * B * IN_FEATURES * OUT_FEATURES,
        transcendentals=B * OUT_FEATURES,
        bytes_accessed=(B * IN_FEATURES * 4
                        + IN_FEATURES * OUT_FEATURES * 4
                        + B * OUT_FEATURES * 4),
    )

    return pl.pallas_call(
        net_kernel,
        out_shape=jax.ShapeDtypeStruct((B, OUT_FEATURES), jnp.float32),
        grid_spec=pltpu.PrefetchScalarGridSpec(
            num_scalar_prefetch=0,
            grid=grid,
            in_specs=[
                # x streamed tile-by-tile over the batch (double-buffered
                # pipeline). Feature axis (784) left full-extent.
                pl.BlockSpec((TB, IN_FEATURES), lambda i: (i, 0)),
                # W is small and grid-invariant -> resident in VMEM.
                pl.BlockSpec((IN_FEATURES, OUT_FEATURES), lambda i: (0, 0)),
            ],
            out_specs=pl.BlockSpec((TB, OUT_FEATURES), lambda i: (i, 0)),
        ),
        compiler_params=pltpu.CompilerParams(
            # Batch tiles are fully independent.
            dimension_semantics=("parallel",),
        ),
        cost_estimate=cost,
    )(x, w)


if __name__ == "__main__":
    key = jax.random.PRNGKey(0)
    kx, kw = jax.random.split(key)

    B = 8  # small batch demo
    # Scale inputs so the naive (PyTorch-style) reference cannot overflow exp;
    # the kernel itself is overflow-safe via max-subtraction.
    x = 0.05 * jax.random.normal(kx, (B, IN_FEATURES), dtype=jnp.float32)
    W = jax.random.normal(kw, (IN_FEATURES, OUT_FEATURES), dtype=jnp.float32)

    out = jax.block_until_ready(net_forward(x, W))

    # Pure-JAX reference matching the PyTorch forward exactly.
    logits_ref = jnp.dot(x, W, precision=jax.lax.Precision.HIGHEST)
    h_ref = jnp.exp(logits_ref)
    ref = h_ref / jnp.sum(h_ref, axis=1, keepdims=True)
    assert out.shape == (B, OUT_FEATURES)
    assert bool(jnp.all(jnp.isfinite(out)))
    assert jnp.allclose(out, ref, rtol=1e-3, atol=1e-6), "mismatch vs reference"

    # Also exercise the multi-tile path (2 full tiles + a partial tail tile)
    # with a batch that is not a multiple of the tile size.
    B2 = 20
    x2 = 0.05 * jax.random.normal(jax.random.PRNGKey(1), (B2, IN_FEATURES),
                                  dtype=jnp.float32)
    out2 = jax.block_until_ready(net_forward(x2, W, block_b=8))
    l2 = jnp.dot(x2, W, precision=jax.lax.Precision.HIGHEST)
    h2 = jnp.exp(l2)
    ref2 = h2 / jnp.sum(h2, axis=1, keepdims=True)
    assert out2.shape == (B2, OUT_FEATURES)
    assert bool(jnp.all(jnp.isfinite(out2)))
    assert jnp.allclose(out2, ref2, rtol=1e-3, atol=1e-6), "mismatch (tail-tile path)"

    print("KERNEL_OK")
</pallas_src>

<mosaic_0001>
module attributes {stable_mosaic.version = 11 : i64} {
  func.func @net_kernel(%arg0: i32, %arg1: memref<8x784xf32, #tpu.memory_space<vmem>>, %arg2: memref<784x10xf32, #tpu.memory_space<vmem>>, %arg3: memref<8x10xf32, #tpu.memory_space<vmem>>) attributes {dimension_semantics = [#tpu.dimension_semantics<parallel>], iteration_bounds = array<i64: 1>, scalar_prefetch = 0 : i64, scratch_operands = 0 : i64, tpu.core_type = #tpu.core_type<tc>, window_params = [{transform_indices = @transform_0, window_bounds = array<i64: 8, 784>}, {pipeline_mode = #tpu.pipeline_mode<synchronous>, transform_indices = @transform_1, window_bounds = array<i64: 784, 10>}, {transform_indices = @transform_2, window_bounds = array<i64: 8, 10>}]} {
    %c0 = arith.constant 0 : index
    %c0_0 = arith.constant 0 : index
    %0 = vector.load %arg1[%c0, %c0_0] : memref<8x784xf32, #tpu.memory_space<vmem>>, vector<8x784xf32>
    %c0_1 = arith.constant 0 : index
    %c0_2 = arith.constant 0 : index
    %1 = vector.load %arg2[%c0_1, %c0_2] : memref<784x10xf32, #tpu.memory_space<vmem>>, vector<784x10xf32>
    %cst = arith.constant dense<0.000000e+00> : vector<8x10xf32>
    %2 = tpu.matmul %0, %1, %cst {dimension_numbers = #tpu.dot_dimension_numbers<[1], [0], [0], [1], [0, 0, 1, 1], [], []>} : vector<8x784xf32>, vector<784x10xf32>, vector<8x10xf32> -> vector<8x10xf32>
    %cst_3 = arith.constant dense<0xFF800000> : vector<8xf32>
    %3 = vector.multi_reduction <maximumf>, %2, %cst_3 [1] : vector<8x10xf32> to vector<8xf32>
    %4 = vector.shape_cast %3 : vector<8xf32> to vector<8x1xf32>
    %5 = vector.broadcast %4 : vector<8x1xf32> to vector<8x10xf32>
    %6 = arith.subf %2, %5 : vector<8x10xf32>
    %7 = math.exp %6 : vector<8x10xf32>
    %cst_4 = arith.constant dense<0.000000e+00> : vector<8xf32>
    %8 = vector.multi_reduction <add>, %7, %cst_4 [1] : vector<8x10xf32> to vector<8xf32>
    %9 = vector.shape_cast %8 : vector<8xf32> to vector<8x1xf32>
    %10 = vector.broadcast %9 : vector<8x1xf32> to vector<8x10xf32>
    %11 = arith.divf %7, %10 : vector<8x10xf32>
    %c0_5 = arith.constant 0 : index
    %c0_6 = arith.constant 0 : index
    %12 = vector.load %arg3[%c0_5, %c0_6] : memref<8x10xf32, #tpu.memory_space<vmem>>, vector<8x10xf32>
    tpu.vector_store %arg3[%c0_5, %c0_6], %11 {strides = array<i32>} : memref<8x10xf32, #tpu.memory_space<vmem>>, vector<8x10xf32>,
    return
  }
  func.func @transform_0(%arg0: i32) -> (i32, i32) {
    %c0_i32 = arith.constant 0 : i32
    %c0_i32_0 = arith.constant 0 : i32
    return %arg0, %c0_i32 : i32, i32
  }
  func.func @transform_1(%arg0: i32) -> (i32, i32) {
    %c0_i32 = arith.constant 0 : i32
    %c0_i32_0 = arith.constant 0 : i32
    %c0_i32_1 = arith.constant 0 : i32
    return %c0_i32, %c0_i32_0 : i32, i32
  }
  func.func @transform_2(%arg0: i32) -> (i32, i32) {
    %c0_i32 = arith.constant 0 : i32
    %c0_i32_0 = arith.constant 0 : i32
    return %arg0, %c0_i32 : i32, i32
  }
}

</mosaic_0001>

<bundles_post_ra>
// kernel: tpu_custom_call.1
= control target key start
LH: loop header
LB: loop body
LE: loop exit
PB: predicated region body
PF: predicated region fallthrough
CT: control target
= control target key end

     0   :  { %s672_s0 = inlined_call_operand.vmem [shape: f32[8,784], index: 0, kind: input, shape index: {}]   ;;  %s673_s1 = inlined_call_operand.vmem [shape: f32[784,10], index: 1, kind: input, shape index: {}]   ;;  %s674_s2 = inlined_call_operand.hbm [shape: f32[8,10], index: 2, kind: output, shape index: {}]  }
   0x1   :  { %v34_v0 = vld [vmem:[%s673_s1 + $0x78] sm:$0xff]  ;;  %v33_v1 = vld [vmem:[%s673_s1 + $0x70] sm:$0xff]  ;;  %v32_v4 = vld [vmem:[%s673_s1 + $0x68] sm:$0xff] }
   0x2   :  { %v50_v2 = vld [vmem:[%s673_s1 + $0xf8] sm:$0xff]  ;;  %121 = vmatpush.msra.mxu0 %v34_v0  ;;  %v49_v3 = vld [vmem:[%s673_s1 + $0xf0] sm:$0xff]  ;;  %v48_v5 = vld [vmem:[%s673_s1 + $0xe8] sm:$0xff] }
   0x3   :  { %141 = vmatpush.msra.mxu1 %v50_v2  ;;  %v31_v6 = vld [vmem:[%s673_s1 + $0x60] sm:$0xff]  ;;  %v30_v8 = vld [vmem:[%s673_s1 + $0x58] sm:$0xff]  ;;  %v65_v11 = vld [vmem:[%s673_s1 + $0x170] sm:$0xff] }
   0x4   :  { %122 = vmatpush.msra.mxu0 %v33_v1  ;;  %v47_v7 = vld [vmem:[%s673_s1 + $0xe0] sm:$0xff]  ;;  %v46_v9 = vld [vmem:[%s673_s1 + $0xd8] sm:$0xff]  ;;  %v29_v13 = vld [vmem:[%s673_s1 + $0x50] sm:$0xff] }
   0x5   :  { %142 = vmatpush.msra.mxu1 %v49_v3  ;;  %v66_v10 = vld [vmem:[%s673_s1 + $0x178] sm:$0xff]  ;;  %v45_v14 = vld [vmem:[%s673_s1 + $0xd0] sm:$0xff]  ;;  %v64_v15 = vld [vmem:[%s673_s1 + $0x168] sm:$0xff] }
   0x6   :  { %123 = vmatpush.msra.mxu0 %v32_v4  ;;  %v82_v12 = vld [vmem:[%s673_s1 + $0x1f8] sm:$0xff]  ;;  %161 = vmatpush.msra.mxu2 %v66_v10  ;;  %v81_v16 = vld [vmem:[%s673_s1 + $0x1f0] sm:$0xff]  ;;  %v28_v17 = vld [vmem:[%s673_s1 + $0x48] sm:$0xff] }
   0x7   :  { %143 = vmatpush.msra.mxu1 %v48_v5  ;;  %181 = vmatpush.msra.mxu3 %v82_v12  ;;  %v44_v18 = vld [vmem:[%s673_s1 + $0xc8] sm:$0xff]  ;;  %v63_v20 = vld [vmem:[%s673_s1 + $0x160] sm:$0xff]  ;;  %v62_v24 = vld [vmem:[%s673_s1 + $0x158] sm:$0xff] }
   0x8   :  { %124 = vmatpush.msra.mxu0 %v31_v6  ;;  %162 = vmatpush.msra.mxu2 %v65_v11  ;;  %v80_v19 = vld [vmem:[%s673_s1 + $0x1e8] sm:$0xff]  ;;  %v79_v21 = vld [vmem:[%s673_s1 + $0x1e0] sm:$0xff]  ;;  %v78_v25 = vld [vmem:[%s673_s1 + $0x1d8] sm:$0xff] }
   0x9   :  { %144 = vmatpush.msra.mxu1 %v47_v7  ;;  %182 = vmatpush.msra.mxu3 %v81_v16  ;;  %v27_v22 = vld [vmem:[%s673_s1 + $0x40] sm:$0xff]  ;;  %v26_v26 = vld [vmem:[%s673_s1 + $0x38] sm:$0xff]  ;;  %v61_v28 = vld [vmem:[%s673_s1 + $0x150] sm:$0xff] }
   0xa   :  { %125 = vmatpush.msra.mxu0 %v30_v8  ;;  %v43_v23 = vld [vmem:[%s673_s1 + $0xc0] sm:$0xff]  ;;  %163 = vmatpush.msra.mxu2 %v64_v15  ;;  %v42_v27 = vld [vmem:[%s673_s1 + $0xb8] sm:$0xff]  ;;  %v77_v29 = vld [vmem:[%s673_s1 + $0x1d0] sm:$0xff] }
   0xb   :  { %145 = vmatpush.msra.mxu1 %v46_v9  ;;  %183 = vmatpush.msra.mxu3 %v80_v19  ;;  %v25_v30 = vld [vmem:[%s673_s1 + $0x30] sm:$0xff]  ;;  %v60_v32 = vld [vmem:[%s673_s1 + $0x148] sm:$0xff]  ;;  %v59_v36 = vld [vmem:[%s673_s1 + $0x140] sm:$0xff] }
   0xc   :  { %126 = vmatpush.msra.mxu0 %v29_v13  ;;  %164 = vmatpush.msra.mxu2 %v63_v20  ;;  %v41_v31 = vld [vmem:[%s673_s1 + $0xb0] sm:$0xff]  ;;  %v76_v33 = vld [vmem:[%s673_s1 + $0x1c8] sm:$0xff]  ;;  %v75_v37 = vld [vmem:[%s673_s1 + $0x1c0] sm:$0xff] }
   0xd   :  { %146 = vmatpush.msra.mxu1 %v45_v14  ;;  %184 = vmatpush.msra.mxu3 %v79_v21  ;;  %v24_v34 = vld [vmem:[%s673_s1 + $0x28] sm:$0xff]  ;;  %v23_v38 = vld [vmem:[%s673_s1 + $0x20] sm:$0xff]  ;;  %v58_v40 = vld [vmem:[%s673_s1 + $0x138] sm:$0xff] }
   0xe   :  { %127 = vmatpush.msra.mxu0 %v28_v17  ;;  %165 = vmatpush.msra.mxu2 %v62_v24  ;;  %v40_v35 = vld [vmem:[%s673_s1 + $0xa8] sm:$0xff]  ;;  %v39_v39 = vld [vmem:[%s673_s1 + $0xa0] sm:$0xff]  ;;  %v74_v41 = vld [vmem:[%s673_s1 + $0x1b8] sm:$0xff] }
   0xf   :  { %147 = vmatpush.msra.mxu1 %v44_v18  ;;  %185 = vmatpush.msra.mxu3 %v78_v25  ;;  %v22_v42 = vld [vmem:[%s673_s1 + $0x18] sm:$0xff]  ;;  %v57_v44 = vld [vmem:[%s673_s1 + $0x130] sm:$0xff]  ;;  %v56_v48 = vld [vmem:[%s673_s1 + $0x128] sm:$0xff] }
  0x10   :  { %128 = vmatpush.msra.mxu0 %v27_v22  ;;  %166 = vmatpush.msra.mxu2 %v61_v28  ;;  %v38_v43 = vld [vmem:[%s673_s1 + $0x98] sm:$0xff]  ;;  %v73_v45 = vld [vmem:[%s673_s1 + $0x1b0] sm:$0xff]  ;;  %v72_v49 = vld [vmem:[%s673_s1 + $0x1a8] sm:$0xff] }
  0x11   :  { %148 = vmatpush.msra.mxu1 %v43_v23  ;;  %186 = vmatpush.msra.mxu3 %v77_v29  ;;  %v21_v46 = vld [vmem:[%s673_s1 + $0x10] sm:$0xff]  ;;  %v20_v50 = vld [vmem:[%s673_s1 + $0x8] sm:$0xff]  ;;  %v55_v52 = vld [vmem:[%s673_s1 + $0x120] sm:$0xff] }
  0x12   :  { %129 = vmatpush.msra.mxu0 %v26_v26  ;;  %167 = vmatpush.msra.mxu2 %v60_v32  ;;  %v37_v47 = vld [vmem:[%s673_s1 + $0x90] sm:$0xff]  ;;  %v36_v51 = vld [vmem:[%s673_s1 + $0x88] sm:$0xff]  ;;  %v71_v53 = vld [vmem:[%s673_s1 + $0x1a0] sm:$0xff] }
  0x13   :  { %149 = vmatpush.msra.mxu1 %v42_v27  ;;  %187 = vmatpush.msra.mxu3 %v76_v33  ;;  %v19_v54 = vld [vmem:[%s673_s1] sm:$0xff]  ;;  %v98_v56 = vld [vmem:[%s673_s1 + $0x278] sm:$0xff]  ;;  %v97_v60 = vld [vmem:[%s673_s1 + $0x270] sm:$0xff] }
  0x14   :  { %130 = vmatpush.msra.mxu0 %v25_v30  ;;  %168 = vmatpush.msra.mxu2 %v59_v36  ;;  %v35_v55 = vld [vmem:[%s673_s1 + $0x80] sm:$0xff]  ;;  %v114_v57 = vld [vmem:[%s673_s1 + $0x2f8] sm:$0xff]  ;;  %v113_v61 = vld [vmem:[%s673_s1 + $0x2f0] sm:$0xff] }
  0x15   :  { %150 = vmatpush.msra.mxu1 %v41_v31  ;;  %188 = vmatpush.msra.mxu3 %v75_v37  ;;  %v54_v58 = vld [vmem:[%s673_s1 + $0x118] sm:$0xff]  ;;  %v53_v62 = vld [vmem:[%s673_s1 + $0x110] sm:$0xff]  ;;  %v96_v0 = vld [vmem:[%s673_s1 + $0x268] sm:$0xff] }
  0x16   :  { %131 = vmatpush.msra.mxu0 %v24_v34  ;;  %169 = vmatpush.msra.mxu2 %v58_v40  ;;  %v70_v59 = vld [vmem:[%s673_s1 + $0x198] sm:$0xff]  ;;  %v69_v63 = vld [vmem:[%s673_s1 + $0x190] sm:$0xff]  ;;  %v112_v1 = vld [vmem:[%s673_s1 + $0x2e8] sm:$0xff] }
  0x17   :  { %151 = vmatpush.msra.mxu1 %v40_v35  ;;  %189 = vmatpush.msra.mxu3 %v74_v41  ;;  %v52_v2 = vld [vmem:[%s673_s1 + $0x108] sm:$0xff]  ;;  %v95_v4 = vld [vmem:[%s673_s1 + $0x260] sm:$0xff] }
  0x18   :  { %132 = vmatpush.msra.mxu0 %v23_v38  ;;  %170 = vmatpush.msra.mxu2 %v57_v44  ;;  %v68_v3 = vld [vmem:[%s673_s1 + $0x188] sm:$0xff]  ;;  %v111_v5 = vld [vmem:[%s673_s1 + $0x2e0] sm:$0xff] }
  0x19   :  { %152 = vmatpush.msra.mxu1 %v39_v39  ;;  %190 = vmatpush.msra.mxu3 %v73_v45 }
  0x1a   :  { %133 = vmatpush.msra.mxu0 %v22_v42  ;;  %171 = vmatpush.msra.mxu2 %v56_v48 }
  0x1b   :  { %153 = vmatpush.msra.mxu1 %v38_v43  ;;  %191 = vmatpush.msra.mxu3 %v72_v49 }
  0x1c   :  { %134 = vmatpush.msra.mxu0 %v21_v46  ;;  %172 = vmatpush.msra.mxu2 %v55_v52 }
  0x1d   :  { %154 = vmatpush.msra.mxu1 %v37_v47  ;;  %192 = vmatpush.msra.mxu3 %v71_v53 }
  0x1e   :  { %135 = vmatpush.msra.mxu0 %v20_v50  ;;  %173 = vmatpush.msra.mxu2 %v54_v58 }
  0x1f   :  { %155 = vmatpush.msra.mxu1 %v36_v51  ;;  %193 = vmatpush.msra.mxu3 %v70_v59 }
  0x20   :  { %136 = vmatpush.msra.mxu0 %v19_v54  ;;  %174 = vmatpush.msra.mxu2 %v53_v62 }
  0x21   :  { %156 = vmatpush.msra.mxu1 %v35_v55  ;;  %194 = vmatpush.msra.mxu3 %v69_v63 }
  0x22   :  { %201 = vmatpush.msrb.mxu0 %v98_v56 }
  0x23   :  { %221 = vmatpush.msrb.mxu1 %v114_v57 }
  0x24   :  { %202 = vmatpush.msrb.mxu0 %v97_v60 }
  0x25   :  { %222 = vmatpush.msrb.mxu1 %v113_v61 }
  0x26   :  { %7 = vsyncpa [#allocation3], 0  ;;  %203 = vmatpush.msrb.mxu0 %v96_v0  ;;  %v51_v6 = vld [vmem:[%s673_s1 + $0x100] sm:$0xff]  ;;  %v94_v8 = vld [vmem:[%s673_s1 + $0x258] sm:$0xff]  ;;  %175 = vmatpush.msra.mxu2 %v52_v2  ;;  %vm117_vm0 = vcmask 130048   ;;  %vm261_vm1 = vcmask 80896  }
  0x27   :  { %223 = vmatpush.msrb.mxu1 %v112_v1  ;;  %v67_v7 = vld [vmem:[%s673_s1 + $0x180] sm:$0xff]  ;;  %v110_v9 = vld [vmem:[%s673_s1 + $0x2d8] sm:$0xff]  ;;  %195 = vmatpush.msra.mxu3 %v68_v3  ;;  %v14_v10 = vld [vmem:[%s672_s0 + $0x10] sm:$0xff]  ;;  %s294_s25 = sshll.u32 %s674_s2, 4  ;;  %s295_s25 = int_to_ptr.hbm [resolvable:$true] %s294_s25 }
  0x28   :  { %204 = vmatpush.msrb.mxu0 %v95_v4  ;;  %v15_v11 = vld [vmem:[%s672_s0 + $0x18] sm:$0xff]  ;;  %v93_v12 = vld [vmem:[%s673_s1 + $0x250] sm:$0xff]  ;;  %176 = vmatpush.msra.mxu2 %v51_v6  ;;  %v116_v14 = vld [vmem:[%s673_s1 + $0x308] sm:$0xff] }
  0x29   :  { %224 = vmatpush.msrb.mxu1 %v111_v5  ;;  %v109_v13 = vld [vmem:[%s673_s1 + $0x2d0] sm:$0xff]  ;;  %196 = vmatpush.msra.mxu3 %v67_v7  ;;  %v12_v15 = vld [vmem:[%s672_s0] sm:$0xff]  ;;  %v92_v16 = vld [vmem:[%s673_s1 + $0x248] sm:$0xff] }
  0x2a   :  { %205 = vmatpush.msrb.mxu0 %v94_v8  ;;  %v108_v17 = vld [vmem:[%s673_s1 + $0x2c8] sm:$0xff]  ;;  %177 = vmatmul.f32.vlgmr.msra.gmra.mxu2 %v14_v10  ;;  %v115_v19 = vld [vmem:[%s673_s1 + $0x300] sm:$0xff]  ;;  %v90_v22 = vld [vmem:[%s673_s1 + $0x238] sm:$0xff] }
  0x2b   :  { %225 = vmatpush.msrb.mxu1 %v110_v9  ;;  %197 = vmatmul.f32.vlgmr.msra.gmra.mxu3 %v15_v11  ;;  %v13_v18 = vld [vmem:[%s672_s0 + $0x8] sm:$0xff]  ;;  %v91_v20 = vld [vmem:[%s673_s1 + $0x240] sm:$0xff]  ;;  %v106_v23 = vld [vmem:[%s673_s1 + $0x2b8] sm:$0xff] }
  0x2c   :  { %206 = vmatpush.msrb.mxu0 %v93_v12  ;;  %v107_v21 = vld [vmem:[%s673_s1 + $0x2c0] sm:$0xff]  ;;  %255 = vmatpush.msrb.mxu2 %v116_v14  ;;  %v18_v24 = vld [vmem:[%s672_s0 + $0x30] sm:$0xff]  ;;  %v88_v27 = vld [vmem:[%s673_s1 + $0x228] sm:$0xff] }
  0x2d   :  { %226 = vmatpush.msrb.mxu1 %v109_v13  ;;  %137 = vmatmul.f32.vlgmr.msra.gmra.mxu0 %v12_v15  ;;  %v89_v25 = vld [vmem:[%s673_s1 + $0x230] sm:$0xff]  ;;  %v104_v28 = vld [vmem:[%s673_s1 + $0x2a8] sm:$0xff]  ;;  %v87_v29 = vld [vmem:[%s673_s1 + $0x220] sm:$0xff] }
  0x2e   :  { %207 = vmatpush.msrb.mxu0 %v92_v16  ;;  %157 = vmatmul.f32.vlgmr.msra.gmra.mxu1 %v13_v18  ;;  %v105_v26 = vld [vmem:[%s673_s1 + $0x2b0] sm:$0xff]  ;;  %v103_v30 = vld [vmem:[%s673_s1 + $0x2a0] sm:$0xff]  ;;  %v86_v31 = vld [vmem:[%s673_s1 + $0x218] sm:$0xff] }
  0x2f   :  { %227 = vmatpush.msrb.mxu1 %v108_v17  ;;  %256 = vmatpush.msrb.mxu2 %v115_v19  ;;  %v102_v32 = vld [vmem:[%s673_s1 + $0x298] sm:$0xff]  ;;  %v85_v33 = vld [vmem:[%s673_s1 + $0x210] sm:$0xff]  ;;  %v84_v35 = vld [vmem:[%s673_s1 + $0x208] sm:$0xff] }
  0x30   :  { %208 = vmatpush.msrb.mxu0 %v91_v20  ;;  %v101_v34 = vld [vmem:[%s673_s1 + $0x290] sm:$0xff]  ;;  %v100_v36 = vld [vmem:[%s673_s1 + $0x288] sm:$0xff]  ;;  %v83_v37 = vld [vmem:[%s673_s1 + $0x200] sm:$0xff] }
  0x31   :  { %228 = vmatpush.msrb.mxu1 %v107_v21  ;;  %v99_v38 = vld [vmem:[%s673_s1 + $0x280] sm:$0xff]  ;;  %v17_v40 = vld [vmem:[%s672_s0 + $0x28] sm:$0xff] }
  0x32   :  { %209 = vmatpush.msrb.mxu0 %v90_v22  ;;  %303 = vmatmul.msk.f32.vlgmr.msrb.gmra.mxu2 %vm117_vm0, %v18_v24  ;;  %v16_v39 = vld [vmem:[%s672_s0 + $0x20] sm:$0xff]  ;;  %s335_s0 = smov [#allocation2]  }
  0x33   :  { %229 = vmatpush.msrb.mxu1 %v106_v23  ;;  %s292_s1 = sshll.u32 %s335_s0, 4  ;;  %s293_s1 = int_to_ptr.vmem [resolvable:$true] %s292_s1 }
  0x34   :  { %210 = vmatpush.msrb.mxu0 %v89_v25 }
  0x35   :  { %230 = vmatpush.msrb.mxu1 %v105_v26 }
  0x36   :  { %211 = vmatpush.msrb.mxu0 %v88_v27 }
  0x37   :  { %231 = vmatpush.msrb.mxu1 %v104_v28 }
  0x38   :  { %212 = vmatpush.msrb.mxu0 %v87_v29 }
  0x39   :  { %232 = vmatpush.msrb.mxu1 %v103_v30 }
  0x3a   :  { %213 = vmatpush.msrb.mxu0 %v86_v31 }
  0x3b   :  { %233 = vmatpush.msrb.mxu1 %v102_v32 }
  0x3c   :  { %214 = vmatpush.msrb.mxu0 %v85_v33 }
  0x3d   :  { %234 = vmatpush.msrb.mxu1 %v101_v34 }
  0x3e   :  { %215 = vmatpush.msrb.mxu0 %v84_v35 }
  0x3f   :  { %235 = vmatpush.msrb.mxu1 %v100_v36 }
  0x40   :  { %216 = vmatpush.msrb.mxu0 %v83_v37 }
  0x41   :  { %236 = vmatpush.msrb.mxu1 %v99_v38  ;;  %217 = vmatmul.f32.vlgmr.msrb.gmra.mxu0 %v16_v39 }
  0x42   :  { %237 = vmatmul.f32.vlgmr.msrb.gmra.mxu1 %v17_v40 }
  0xaa   :  { %v138_v41 = vpop.f32.mrf.mxu0 }
  0xab   :  { %v158_v42 = vpop.f32.mrf.mxu1 }
  0xac   :  { %v159_v43 = vadd.f32 %v158_v42, %v138_v41 }
  0xad   :  { %v178_v44 = vpop.f32.mrf.mxu2 }
  0xae   :  { %v179_v45 = vadd.f32 %v178_v44, %v159_v43  ;;  %v198_v46 = vpop.f32.mrf.mxu3 }
  0xb0   :  { %v199_v47 = vadd.f32 %v198_v46, %v179_v45 }
  0xb5   :  { %v258_v51 = vpop.f32.mrf.mxu2 }
  0xbe   :  { %v218_v48 = vpop.f32.mrf.mxu0 }
  0xbf   :  { %v238_v49 = vpop.f32.mrf.mxu1  ;;  %v219_v50 = vadd.f32 %v218_v48, %v199_v47 }
  0xc1   :  { %v239_v52 = vadd.f32 %v238_v49, %v219_v50 }
  0xc3   :  { %v259_v53 = vadd.f32 %v258_v51, %v239_v52 }
  0xc5   :  { %v262_v54 = vsel %vm261_vm1, %v259_v53, -inf }
  0xc6   :  { %263 = vmax.xlane.f32.xlu0 %v262_v54 }
 0x139   :  { %v264_v55 = vpop.xlane.xlu0 %263 }
 0x13a   :  { %v265_v56 = vsub.f32 %v259_v53, %v264_v55 }
 0x13c   :  { %v266_v57 = vmul.f32 1.442695, %v265_v56 }
 0x13e   :  { %305 = vpow2.f32 %v266_v57 }
 0x144   :  { %v306_v58 = vpop.eup %305 }
 0x145   :  { %v268_v59 = vsel %vm261_vm1, %v306_v58, 0.0 }
 0x146   :  { %269 = vadd.xlane.f32.xlu0 %v268_v59 }
 0x1b9   :  { %v270_v60 = vpop.xlane.xlu0 %269 }
 0x1ba   :  { %307 = vrcp.f32 %v270_v60  ;;  %v282_v0 = vand.u32 2147483648, %v270_v60  ;;  %v280_v2 = vand.u32 2147483647, %v270_v60  ;;  %vm276_vm3 = vweird.f32 %v270_v60 }
 0x1bc   :  { %v283_v4 = vor.u32 1.1754944e-38, %v282_v0  ;;  %vm281_vm5 = vcmp.eq.f32.partialorder %v280_v2, 8.507059e+37 }
 0x1c0   :  { %v308_v61 = vpop.eup %307 }
 0x1c1   :  { %v272_v62 = vmul.f32 %v308_v61, %v270_v60  ;;  %vm277_vm2 = vweird.f32 %v308_v61 }
 0x1c2   :  { %vm278_vm4 = vmor %vm276_vm3, %vm277_vm2 }
 0x1c3   :  { %v273_v63 = vsub.f32 1.0, %v272_v62 }
 0x1c5   :  { %v274_v1 = vmul.f32 %v308_v61, %v273_v63 }
 0x1c7   :  { %v275_v3 = vadd.f32 %v308_v61, %v274_v1 }
 0x1c9   :  { %v279_v5 = vsel %vm278_vm4, %v308_v61, %v275_v3 }
 0x1ca   :  { %v284_v6 = vsel %vm281_vm5, %v283_v4, %v279_v5 }
 0x1cb   :  { %v285_v7 = vmul.f32 %v306_v58, %v284_v6 }
 0x1cd   :  { %286 = vst.msk [vmem:[#allocation2] sm:$0xff] %vm261_vm1, %v285_v7 }
 0x1ce   :  { %297 = dma.vmem_to_hbm [thread:$0]  %s293_s1, 128, %s295_s25, [#allocation3]  }
 0x1cf   :  { %333 = dma.done.wait [#allocation3], 128  }
 0x1d0   :  { %334 = vsyncadd [#allocation3], 4294967168 }
 0x1d1   :  { %302 = vsyncpa [#allocation3], 1 }

</bundles_post_ra>
